<compile_context>
chip_gen: v6e
topology: v6e:2x2x1
jax: 0.10.0
libtpu: 0.0.40
codegen_flags: <defaults>
</compile_context>

<pallas_src>
import functools

import jax
import jax.numpy as jnp
from jax.experimental import pallas as pl
from jax.experimental.pallas import tpu as pltpu


_LANE = 128
_SUBLANE = 8


def _round_up(v, m):
    return ((v + m - 1) // m) * m


def _default_act_dtype():
    """bf16 elementwise on chips with a bf16 VPU/EUP (v6e/v7x), f32 otherwise."""
    try:
        kind = jax.devices()[0].device_kind.lower()
    except Exception:
        return jnp.float32
    for tag in ("v2", "v3", "v4", "v5"):
        if tag in kind:
            return jnp.float32
    return jnp.bfloat16


def policy_discrete_kernel(x_ref, w1_ref, b1_ref, w2_ref, b2_ref,
                           wh_ref, bh_ref, out_ref, *, act_dtype):
    # Weights / biases are VMEM-resident across the whole batch grid (constant
    # index_maps); x and out are the only per-step DMAs.
    x = x_ref[...].astype(jnp.bfloat16)                       # MXU operand

    # --- net: 2-layer tanh MLP (f32 accumulate, f32 bias add) ---
    z1 = jnp.dot(x, w1_ref[...], preferred_element_type=jnp.float32) + b1_ref[...]
    h1 = jnp.tanh(z1.astype(act_dtype))                       # EUP; bf16 on v6e/v7x
    z2 = (jnp.dot(h1.astype(jnp.bfloat16), w2_ref[...],
                  preferred_element_type=jnp.float32) + b2_ref[...])
    h2 = jnp.tanh(z2.astype(act_dtype))

    # --- action head (true action_num, no lane padding of the output) ---
    logits = (jnp.dot(h2.astype(jnp.bfloat16), wh_ref[...],
                      preferred_element_type=jnp.float32) + bh_ref[...])

    # --- softmax over actions (f32) ---
    m = jnp.max(logits, axis=-1, keepdims=True)
    e = jnp.exp(logits - m)
    denom = jnp.sum(e, axis=-1, keepdims=True)
    r = pl.reciprocal(denom, approx=True)                     # EUP vrcp (free slot)
    r = r * (2.0 - denom * r)                                 # one Newton step
    out_ref[...] = (e * r).astype(out_ref.dtype)


def prepare_params(params):
    """Pad hidden dims to 128 and cast matmul weights to bf16 ONCE (outside jit)."""
    w1, b1, w2, b2, wh, bh = params
    D, H = w1.shape
    A = wh.shape[1]
    H_p = _round_up(H, _LANE)

    def pad2(a, rows, cols):
        return jnp.pad(a, ((0, rows - a.shape[0]), (0, cols - a.shape[1])))

    w1_p = pad2(w1, D, H_p).astype(jnp.bfloat16)          # (D,   H_p)
    b1_p = pad2(b1.reshape(1, -1), 1, H_p).astype(jnp.float32)
    w2_p = pad2(w2, H_p, H_p).astype(jnp.bfloat16)        # (H_p, H_p)  zero pad rows/cols
    b2_p = pad2(b2.reshape(1, -1), 1, H_p).astype(jnp.float32)
    wh_p = pad2(wh, H_p, A).astype(jnp.bfloat16)          # (H_p, A)    zero pad rows
    bh_p = bh.reshape(1, -1).astype(jnp.float32)          # (1,   A)
    return (w1_p, b1_p, w2_p, b2_p, wh_p, bh_p)


@functools.partial(jax.jit, static_argnames=("block_batch", "act_dtype"))
def policy_discrete_forward(x, padded_params, block_batch=1024,
                            act_dtype=jnp.float32):
    """Returns the Categorical probabilities, shape (batch, action_num)."""
    w1, b1, w2, b2, wh, bh = padded_params
    B, D = x.shape
    H_p = w1.shape[1]
    A = wh.shape[1]

    # Batch tile: large enough to amortize per-grid-step overhead, but split
    # into >=2 tiles whenever possible so v7x's dual TensorCores both run.
    if B <= 2 * block_batch:
        TB = _round_up(pl.cdiv(B, 2), _SUBLANE)
    else:
        TB = block_batch
    TB = max(_SUBLANE, min(TB, _round_up(B, _SUBLANE)))
    nb = pl.cdiv(B, TB)                    # partial last block is masked by Pallas

    # Real tile footprint -> explicit scoped-VMEM budget (safe on v7x's 64 MiB).
    weight_bytes = (2 * (D * H_p + H_p * H_p + H_p * A)        # bf16 weights
                    + 4 * (2 * H_p + A))                       # f32 biases
    tile_bytes = 4 * TB * (D + A)                              # x + out tiles (f32)
    interm_bytes = 4 * TB * H_p * 3                            # z/h intermediates
    vmem_need = 2 * (weight_bytes + tile_bytes) + interm_bytes
    vmem_limit = int(min(max(2 * vmem_need, 32 << 20), 56 << 20))

    flops = 2 * B * (D * H_p + H_p * H_p + H_p * A)
    transcendentals = B * (2 * H_p + A)                        # tanh x2 + exp
    bytes_accessed = 4 * B * (D + A) + weight_bytes

    res = lambda shape: pl.BlockSpec(shape, lambda i: (0, 0))  # VMEM-resident params

    probs = pl.pallas_call(
        functools.partial(policy_discrete_kernel, act_dtype=act_dtype),
        out_shape=jax.ShapeDtypeStruct((B, A), jnp.float32),
        grid=(nb,),
        in_specs=[
            pl.BlockSpec((TB, D), lambda i: (i, 0)),   # x: batch tiled, D unpadded
            res((D, H_p)), res((1, H_p)),              # w1, b1
            res((H_p, H_p)), res((1, H_p)),            # w2, b2
            res((H_p, A)), res((1, A)),                # wh, bh
        ],
        out_specs=pl.BlockSpec((TB, A), lambda i: (i, 0)),     # probs: A unpadded
        compiler_params=pltpu.CompilerParams(
            dimension_semantics=("parallel",),
            vmem_limit_bytes=vmem_limit),
        cost_estimate=pl.CostEstimate(
            flops=int(flops),
            transcendentals=int(transcendentals),
            bytes_accessed=int(bytes_accessed)),
    )(x.astype(jnp.float32), w1, b1, w2, b2, wh, bh)
    return probs


def init_params(key, in_dim, hidden, action_num):
    k1, k2, k3 = jax.random.split(key, 3)

    def linear_init(k, fan_in, fan_out):
        # PyTorch nn.Linear default: U(-1/sqrt(fan_in), 1/sqrt(fan_in))
        bound = 1.0 / jnp.sqrt(fan_in)
        kw, kb = jax.random.split(k)
        w = jax.random.uniform(kw, (fan_in, fan_out), jnp.float32, -bound, bound)
        b = jax.random.uniform(kb, (1, fan_out), jnp.float32, -bound, bound)
        return w, b

    w1, b1 = linear_init(k1, in_dim, hidden)
    w2, b2 = linear_init(k2, hidden, hidden)
    wh, bh = linear_init(k3, hidden, action_num)
    # PolicyDiscrete.__init__: action_head.weight *= 0.1 ; action_head.bias *= 0.0
    wh = wh * 0.1
    bh = bh * 0.0
    return (w1, b1, w2, b2, wh, bh)


def reference_forward(x, params, matmul_dtype=jnp.float32):
    """Pure-JAX reference. matmul_dtype=bf16 mirrors the kernel's MXU path."""
    w1, b1, w2, b2, wh, bh = params
    c = lambda a: a.astype(matmul_dtype)
    h1 = jnp.tanh(jnp.dot(c(x), c(w1), preferred_element_type=jnp.float32) + b1)
    h2 = jnp.tanh(jnp.dot(c(h1), c(w2), preferred_element_type=jnp.float32) + b2)
    logits = jnp.dot(c(h2), c(wh), preferred_element_type=jnp.float32) + bh
    return jax.nn.softmax(logits, axis=1)


# TODO(synk): Categorical distribution methods (sample / log_prob / kl /
# mean_sample) and get_fim are host-side distribution logic, not part of the
# fused kernel; the kernel returns the probabilities that parametrize them.

if __name__ == "__main__":
    key = jax.random.PRNGKey(0)
    kx, kp = jax.random.split(key)

    batch, in_dim, hidden, action_num = 8, 32, 64, 16
    x = jax.random.normal(kx, (batch, in_dim), jnp.float32)
    params = init_params(kp, in_dim, hidden, action_num)

    # Pad / cast the (tiny) parameters exactly once, outside the forward path.
    padded_params = prepare_params(params)
    act_dtype = _default_act_dtype()

    probs = policy_discrete_forward(x, padded_params, act_dtype=act_dtype)
    jax.block_until_ready(probs)

    assert probs.shape == (batch, action_num)
    # Valid probability rows.
    assert jnp.allclose(jnp.sum(probs, axis=1), 1.0, atol=1e-5)

    # Check vs a reference that uses the same bf16 MXU inputs.
    ref_bf16 = reference_forward(x, params, matmul_dtype=jnp.bfloat16)
    assert jnp.allclose(probs, ref_bf16, atol=1e-3, rtol=1e-2)

    # Semantic check vs full-f32 PyTorch-equivalent math.
    ref_f32 = reference_forward(x, params, matmul_dtype=jnp.float32)
    assert jnp.allclose(probs, ref_f32, atol=3e-3)

    print("KERNEL_OK")
</pallas_src>

<mosaic_0001>
module attributes {stable_mosaic.version = 11 : i64} {
  func.func @policy_discrete_kernel(%arg0: i32, %arg1: memref<8x32xf32, #tpu.memory_space<vmem>>, %arg2: memref<32x128xbf16, #tpu.memory_space<vmem>>, %arg3: memref<1x128xf32, #tpu.memory_space<vmem>>, %arg4: memref<128x128xbf16, #tpu.memory_space<vmem>>, %arg5: memref<1x128xf32, #tpu.memory_space<vmem>>, %arg6: memref<128x16xbf16, #tpu.memory_space<vmem>>, %arg7: memref<1x16xf32, #tpu.memory_space<vmem>>, %arg8: memref<8x16xf32, #tpu.memory_space<vmem>>) attributes {dimension_semantics = [#tpu.dimension_semantics<parallel>], iteration_bounds = array<i64: 1>, scalar_prefetch = 0 : i64, scratch_operands = 0 : i64, tpu.core_type = #tpu.core_type<tc>, window_params = [{transform_indices = @transform_0, window_bounds = array<i64: 8, 32>}, {pipeline_mode = #tpu.pipeline_mode<synchronous>, transform_indices = @transform_1, window_bounds = array<i64: 32, 128>}, {pipeline_mode = #tpu.pipeline_mode<synchronous>, transform_indices = @transform_2, window_bounds = array<i64: 1, 128>}, {pipeline_mode = #tpu.pipeline_mode<synchronous>, transform_indices = @transform_3, window_bounds = array<i64: 128, 128>}, {pipeline_mode = #tpu.pipeline_mode<synchronous>, transform_indices = @transform_4, window_bounds = array<i64: 1, 128>}, {pipeline_mode = #tpu.pipeline_mode<synchronous>, transform_indices = @transform_5, window_bounds = array<i64: 128, 16>}, {pipeline_mode = #tpu.pipeline_mode<synchronous>, transform_indices = @transform_6, window_bounds = array<i64: 1, 16>}, {transform_indices = @transform_7, window_bounds = array<i64: 8, 16>}]} {
    %c0 = arith.constant 0 : index
    %c0_0 = arith.constant 0 : index
    %0 = vector.load %arg1[%c0, %c0_0] : memref<8x32xf32, #tpu.memory_space<vmem>>, vector<8x32xf32>
    %1 = arith.truncf %0 : vector<8x32xf32> to vector<8x32xbf16>
    %c0_1 = arith.constant 0 : index
    %c0_2 = arith.constant 0 : index
    %2 = vector.load %arg2[%c0_1, %c0_2] : memref<32x128xbf16, #tpu.memory_space<vmem>>, vector<32x128xbf16>
    %cst = arith.constant dense<0.000000e+00> : vector<8x128xf32>
    %3 = tpu.matmul %1, %2, %cst {dimension_numbers = #tpu.dot_dimension_numbers<[1], [0], [0], [1], [0, 0, 1, 1], [], []>} : vector<8x32xbf16>, vector<32x128xbf16>, vector<8x128xf32> -> vector<8x128xf32>
    %c0_3 = arith.constant 0 : index
    %c0_4 = arith.constant 0 : index
    %4 = vector.load %arg3[%c0_3, %c0_4] : memref<1x128xf32, #tpu.memory_space<vmem>>, vector<1x128xf32>
    %5 = vector.broadcast %4 : vector<1x128xf32> to vector<8x128xf32>
    %6 = arith.addf %3, %5 : vector<8x128xf32>
    %7 = arith.truncf %6 : vector<8x128xf32> to vector<8x128xbf16>
    %8 = math.tanh %7 : vector<8x128xbf16>
    %c0_5 = arith.constant 0 : index
    %c0_6 = arith.constant 0 : index
    %9 = vector.load %arg4[%c0_5, %c0_6] : memref<128x128xbf16, #tpu.memory_space<vmem>>, vector<128x128xbf16>
    %cst_7 = arith.constant dense<0.000000e+00> : vector<8x128xf32>
    %10 = tpu.matmul %8, %9, %cst_7 {dimension_numbers = #tpu.dot_dimension_numbers<[1], [0], [0], [1], [0, 0, 1, 1], [], []>} : vector<8x128xbf16>, vector<128x128xbf16>, vector<8x128xf32> -> vector<8x128xf32>
    %c0_8 = arith.constant 0 : index
    %c0_9 = arith.constant 0 : index
    %11 = vector.load %arg5[%c0_8, %c0_9] : memref<1x128xf32, #tpu.memory_space<vmem>>, vector<1x128xf32>
    %12 = vector.broadcast %11 : vector<1x128xf32> to vector<8x128xf32>
    %13 = arith.addf %10, %12 : vector<8x128xf32>
    %14 = arith.truncf %13 : vector<8x128xf32> to vector<8x128xbf16>
    %15 = math.tanh %14 : vector<8x128xbf16>
    %c0_10 = arith.constant 0 : index
    %c0_11 = arith.constant 0 : index
    %16 = vector.load %arg6[%c0_10, %c0_11] : memref<128x16xbf16, #tpu.memory_space<vmem>>, vector<128x16xbf16>
    %cst_12 = arith.constant dense<0.000000e+00> : vector<8x16xf32>
    %17 = tpu.matmul %15, %16, %cst_12 {dimension_numbers = #tpu.dot_dimension_numbers<[1], [0], [0], [1], [0, 0, 1, 1], [], []>} : vector<8x128xbf16>, vector<128x16xbf16>, vector<8x16xf32> -> vector<8x16xf32>
    %c0_13 = arith.constant 0 : index
    %c0_14 = arith.constant 0 : index
    %18 = vector.load %arg7[%c0_13, %c0_14] : memref<1x16xf32, #tpu.memory_space<vmem>>, vector<1x16xf32>
    %19 = vector.broadcast %18 : vector<1x16xf32> to vector<8x16xf32>
    %20 = arith.addf %17, %19 : vector<8x16xf32>
    %cst_15 = arith.constant dense<0xFF800000> : vector<8xf32>
    %21 = vector.multi_reduction <maximumf>, %20, %cst_15 [1] : vector<8x16xf32> to vector<8xf32>
    %22 = vector.shape_cast %21 : vector<8xf32> to vector<8x1xf32>
    %23 = vector.broadcast %22 : vector<8x1xf32> to vector<8x16xf32>
    %24 = arith.subf %20, %23 : vector<8x16xf32>
    %25 = math.exp %24 : vector<8x16xf32>
    %cst_16 = arith.constant dense<0.000000e+00> : vector<8xf32>
    %26 = vector.multi_reduction <add>, %25, %cst_16 [1] : vector<8x16xf32> to vector<8xf32>
    %27 = vector.shape_cast %26 : vector<8xf32> to vector<8x1xf32>
    %28 = tpu.reciprocal %27 {approx = true} : vector<8x1xf32> -> vector<8x1xf32>
    %29 = arith.mulf %27, %28 : vector<8x1xf32>
    %cst_17 = arith.constant 2.000000e+00 : f32
    %30 = vector.broadcast %cst_17 : f32 to vector<8x1xf32>
    %31 = arith.subf %30, %29 : vector<8x1xf32>
    %32 = arith.mulf %28, %31 : vector<8x1xf32>
    %33 = vector.broadcast %32 : vector<8x1xf32> to vector<8x16xf32>
    %34 = arith.mulf %25, %33 : vector<8x16xf32>
    %c0_18 = arith.constant 0 : index
    %c0_19 = arith.constant 0 : index
    %35 = vector.load %arg8[%c0_18, %c0_19] : memref<8x16xf32, #tpu.memory_space<vmem>>, vector<8x16xf32>
    tpu.vector_store %arg8[%c0_18, %c0_19], %34 {strides = array<i32>} : memref<8x16xf32, #tpu.memory_space<vmem>>, vector<8x16xf32>,
    return
  }
  func.func @transform_0(%arg0: i32) -> (i32, i32) {
    %c0_i32 = arith.constant 0 : i32
    %c0_i32_0 = arith.constant 0 : i32
    return %arg0, %c0_i32 : i32, i32
  }
  func.func @transform_1(%arg0: i32) -> (i32, i32) {
    %c0_i32 = arith.constant 0 : i32
    %c0_i32_0 = arith.constant 0 : i32
    %c0_i32_1 = arith.constant 0 : i32
    return %c0_i32, %c0_i32_0 : i32, i32
  }
  func.func @transform_2(%arg0: i32) -> (i32, i32) {
    %c0_i32 = arith.constant 0 : i32
    %c0_i32_0 = arith.constant 0 : i32
    %c0_i32_1 = arith.constant 0 : i32
    return %c0_i32, %c0_i32_0 : i32, i32
  }
  func.func @transform_3(%arg0: i32) -> (i32, i32) {
    %c0_i32 = arith.constant 0 : i32
    %c0_i32_0 = arith.constant 0 : i32
    %c0_i32_1 = arith.constant 0 : i32
    return %c0_i32, %c0_i32_0 : i32, i32
  }
  func.func @transform_4(%arg0: i32) -> (i32, i32) {
    %c0_i32 = arith.constant 0 : i32
    %c0_i32_0 = arith.constant 0 : i32
    %c0_i32_1 = arith.constant 0 : i32
    return %c0_i32, %c0_i32_0 : i32, i32
  }
  func.func @transform_5(%arg0: i32) -> (i32, i32) {
    %c0_i32 = arith.constant 0 : i32
    %c0_i32_0 = arith.constant 0 : i32
    %c0_i32_1 = arith.constant 0 : i32
    return %c0_i32, %c0_i32_0 : i32, i32
  }
  func.func @transform_6(%arg0: i32) -> (i32, i32) {
    %c0_i32 = arith.constant 0 : i32
    %c0_i32_0 = arith.constant 0 : i32
    %c0_i32_1 = arith.constant 0 : i32
    return %c0_i32, %c0_i32_0 : i32, i32
  }
  func.func @transform_7(%arg0: i32) -> (i32, i32) {
    %c0_i32 = arith.constant 0 : i32
    %c0_i32_0 = arith.constant 0 : i32
    return %arg0, %c0_i32 : i32, i32
  }
}

</mosaic_0001>

<bundles_post_ra>
// kernel: policy_discrete_forward.1
= control target key start
LH: loop header
LB: loop body
LE: loop exit
PB: predicated region body
PF: predicated region fallthrough
CT: control target
= control target key end

     0   :  { %12 = vsyncpa [#allocation3], 0  ;;  %s711_s0 = inlined_call_operand.vmem [shape: f32[8,32], index: 0, kind: input, shape index: {}]   ;;  %s712_s1 = inlined_call_operand.hbm [shape: bf16[32,128], index: 1, kind: input, shape index: {}]   ;;  %s713_s2 = inlined_call_operand.vmem [shape: f32[1,128], index: 2, kind: input, shape index: {}]   ;;  %s714_s3 = inlined_call_operand.vmem [shape: bf16[128,128], index: 3, kind: input, shape index: {}]   ;;  %s715_s4 = inlined_call_operand.hbm [shape: f32[1,128], index: 4, kind: input, shape index: {}]   ;;  %s716_s5 = inlined_call_operand.vmem [shape: bf16[128,16], index: 5, kind: input, shape index: {}]   ;;  %s717_s6 = inlined_call_operand.vmem [shape: f32[1,16], index: 6, kind: input, shape index: {}]   ;;  %s718_s7 = inlined_call_operand.hbm [shape: f32[8,16], index: 7, kind: output, shape index: {}]  }
   0x1   :  { %13 = vsyncpa [#allocation6], 0 }
   0x2   :  { %14 = vsyncpa [#allocation4], 0  ;;  %s571_s24 = smov [#allocation2]  }
   0x3   :  { %s22_s25 = sshll.u32 %s571_s24, 4  ;;  %s23_s25 = int_to_ptr.vmem [resolvable:$true] %s22_s25 }
   0x4   :  { %s513_s26 = scalar_lea.vmem %s23_s25, 256  ;;  %p518_p1 = scmp.lt.s32.totalorder %s23_s25, %s23_s25 }
   0x5   :  { %p514_p0 = scmp.ne.s32.totalorder %s23_s25, %s513_s26  ;;  %p519_p2 = scmp.lt.s32.totalorder %s513_s26, %s513_s26 }
   0x7   :  { %p520_p3 = por %p519_p2, %p518_p1 }
   0x9   :  { %p521_p4 = pnand %p520_p3, %p514_p0 }
   0xb   :  { %524 = shalt.err (!%p521_p4)
}
   0xc   :  { %s572_s27 = smov 64   ;;  %s573_s28 = smov 4  }
   0xd   :  { %28 = dma.hbm_to_vmem [thread:$0]  %s712_s1, 256, %s23_s25, [#allocation3], %s572_s27, %s572_s27, %s573_s28  }
   0xe   :  { %s574_s8 = smov [#allocation5]  }
   0xf   :  { %s39_s9 = sshll.u32 %s574_s8, 4  ;;  %s40_s9 = int_to_ptr.vmem [resolvable:$true] %s39_s9 }
  0x10   :  { %s533_s10 = scalar_lea.vmem %s40_s9, 16  ;;  %s537_s11 = scalar_lea.vmem %s40_s9, 32 }
  0x11   :  { %p534_p5 = scmp.ne.s32.totalorder %s40_s9, %s533_s10  ;;  %p538_p6 = scmp.lt.s32.totalorder %s40_s9, %s40_s9 }
  0x12   :  { %p539_p7 = scmp.lt.s32.totalorder %s537_s11, %s533_s10 }
  0x14   :  { %p540_p8 = por %p539_p7, %p538_p6 }
  0x16   :  { %p541_p9 = pnand %p540_p8, %p534_p5 }
  0x18   :  { %544 = shalt.err (!%p541_p9)
}
  0x19   :  { %42 = dma.hbm_to_vmem [thread:$0]  %s715_s4, 16, %s40_s9, [#allocation6]  }
  0x1a   :  { %565 = dma.done.wait [#allocation3], 256  }
  0x1b   :  { %566 = vsyncadd [#allocation3], 4294967040 }
  0x1c   :  { %567 = dma.done.wait [#allocation6], 16  }
  0x1d   :  { %568 = vsyncadd [#allocation6], 4294967280  ;;  %v575_v0 = vmov 0.0   ;;  %vm576_vm0 = vmmov 0   ;;  %v479_v1 = vld [vmem:[#allocation2 + $0x8] sm:$0xff]   ;;  %v480_v2 = vld [vmem:[#allocation2] sm:$0xff]  }
  0x1e   :  { %424 = vmatprep.subr.bf16.mxu0 %v575_v0  ;;  %428 = vmatprep.mubr.msk.bf16.mxu0 %vm576_vm0, %v575_v0  ;;  %v54_v3 = vld [vmem:[%s711_s0] sm:$0xff]  ;;  %v481_v4 = vld [vmem:[%s714_s3 + $0x38] sm:$0xff]   ;;  %vm79_vm1 = vcmask 261120   ;;  %v482_v6 = vld [vmem:[%s714_s3 + $0x30] sm:$0xff]   ;;  %vm349_vm2 = vcmask 130048  }
  0x1f   :  { %432 = vmatprep.subr.bf16.mxu1 %v575_v0  ;;  %448 = vmatprep.mubr.msk.bf16.mxu1 %vm576_vm0, %v575_v0  ;;  %v55_v5 = vpack.c.bf16 %v54_v3, %v54_v3  ;;  %v483_v7 = vld [vmem:[%s714_s3 + $0x28] sm:$0xff]   ;;  %v484_v8 = vld [vmem:[%s714_s3 + $0x20] sm:$0xff]   ;;  %v485_v9 = vld [vmem:[%s714_s3 + $0x18] sm:$0xff]  }
  0x20   :  { %425 = vmatpush3.bf16.msra.mxu0 %v479_v1  ;;  %433 = vmatpush3.bf16.msra.mxu1 %v481_v4  ;;  %v486_v10 = vld [vmem:[%s714_s3 + $0x10] sm:$0xff]   ;;  %v487_v11 = vld [vmem:[%s714_s3 + $0x8] sm:$0xff]   ;;  %v488_v12 = vld [vmem:[%s714_s3] sm:$0xff]  }
  0x21   :  { %426 = vmatprep.subr.bf16.mxu0 %v575_v0  ;;  %434 = vmatprep.subr.bf16.mxu1 %v575_v0  ;;  %v489_v13 = vld [vmem:[%s716_s5 + $0x38] sm:$0xff]   ;;  %v490_v14 = vld [vmem:[%s716_s5 + $0x30] sm:$0xff]   ;;  %v491_v15 = vld [vmem:[%s716_s5 + $0x28] sm:$0xff]  }
  0x22   :  { %v381_v16 = vld [vmem:[%s713_s2] ss:$0 sm:$0xff]  ;;  %v493_v25 = vld [vmem:[%s716_s5 + $0x18] sm:$0xff]   ;;  %v494_v26 = vld [vmem:[%s716_s5 + $0x10] sm:$0xff]  }
  0x23   :  { %v492_v24 = vld [vmem:[%s716_s5 + $0x20] sm:$0xff]   ;;  %v495_v27 = vld [vmem:[%s716_s5 + $0x8] sm:$0xff]   ;;  %v385_v29 = vld [vmem:[#allocation5] ss:$0 sm:$0xff] }
  0x24   :  { %427 = vmatpush3.bf16.msra.mxu0 %v480_v2  ;;  %435 = vmatpush3.bf16.msra.mxu1 %v482_v6  ;;  %v496_v28 = vld [vmem:[%s716_s5] sm:$0xff]   ;;  %s577_s5 = smov [#allocation7]  }
  0x25   :  { %452 = vmatprep.subr.bf16.mxu0 %v575_v0  ;;  %436 = vmatprep.subr.bf16.mxu1 %v575_v0  ;;  %v394_v37 = vld [vmem:[%s717_s6] ss:$0 sm:$0xff]  ;;  %s371_s6 = sshll.u32 %s577_s5, 4  ;;  %s372_s6 = int_to_ptr.vmem [resolvable:$true] %s371_s6 }
  0x26   :  { %s545_s21 = scalar_lea.vmem %s372_s6, 128  ;;  %p550_p11 = scmp.lt.s32.totalorder %s372_s6, %s372_s6 }
  0x27   :  { %429 = vmatmul.mubr.msk.bf16.vlgmr.msra.gmra.mxu0 %vm79_vm1, %v55_v5  ;;  %p546_p10 = scmp.ne.s32.totalorder %s372_s6, %s545_s21  ;;  %p551_p12 = scmp.lt.s32.totalorder %s545_s21, %s545_s21 }
  0x28   :  { %468 = vmatprep.mubr.msk.bf16.mxu0 %vm576_vm0, %v575_v0  ;;  %437 = vmatpush3.bf16.msra.mxu1 %v483_v7 }
  0x29   :  { %438 = vmatprep.subr.bf16.mxu1 %v575_v0  ;;  %453 = vmatpush3.bf16.msra.mxu0 %v489_v13  ;;  %p552_p13 = por %p551_p12, %p550_p11 }
  0x2a   :  { %454 = vmatprep.subr.bf16.mxu0 %v575_v0 }
  0x2b   :  { %p553_p0 = pnand %p552_p13, %p546_p10 }
  0x2c   :  { %439 = vmatpush3.bf16.msra.mxu1 %v484_v8 }
  0x2d   :  { %440 = vmatprep.subr.bf16.mxu1 %v575_v0  ;;  %455 = vmatpush3.bf16.msra.mxu0 %v490_v14 }
  0x2e   :  { %456 = vmatprep.subr.bf16.mxu0 %v575_v0 }
  0x30   :  { %441 = vmatpush3.bf16.msra.mxu1 %v485_v9 }
  0x31   :  { %442 = vmatprep.subr.bf16.mxu1 %v575_v0  ;;  %457 = vmatpush3.bf16.msra.mxu0 %v491_v15 }
  0x32   :  { %458 = vmatprep.subr.bf16.mxu0 %v575_v0 }
  0x34   :  { %443 = vmatpush3.bf16.msra.mxu1 %v486_v10 }
  0x35   :  { %444 = vmatprep.subr.bf16.mxu1 %v575_v0  ;;  %459 = vmatpush3.bf16.msra.mxu0 %v492_v24 }
  0x36   :  { %460 = vmatprep.subr.bf16.mxu0 %v575_v0 }
  0x38   :  { %445 = vmatpush3.bf16.msra.mxu1 %v487_v11 }
  0x39   :  { %446 = vmatprep.subr.bf16.mxu1 %v575_v0  ;;  %461 = vmatpush3.bf16.msra.mxu0 %v493_v25 }
  0x3a   :  { %462 = vmatprep.subr.bf16.mxu0 %v575_v0 }
  0x3c   :  { %447 = vmatpush3.bf16.msra.mxu1 %v488_v12 }
  0x3d   :  { %463 = vmatpush3.bf16.msra.mxu0 %v494_v26 }
  0x3e   :  { %464 = vmatprep.subr.bf16.mxu0 %v575_v0 }
  0x41   :  { %465 = vmatpush3.bf16.msra.mxu0 %v495_v27 }
  0x42   :  { %466 = vmatprep.subr.bf16.mxu0 %v575_v0 }
  0x45   :  { %467 = vmatpush3.bf16.msra.mxu0 %v496_v28 }
  0xe7   :  { %v117_v17 = vpop.f32.mrf.mxu0 }
  0xe8   :  { %v118_v18 = vadd.f32 %v381_v16, %v117_v17 }
  0xe9   :  { %v430_v19 = vpop.f32.mrf.mxu0 }
  0xea   :  { %v123_v20 = vpack.c.bf16 %v118_v18, %v118_v18 }
  0xeb   :  { %v120_v21 = vpop.f32.mrf.mxu0 }
  0xec   :  { %497 = vtanh.bf16 %v123_v20 }
  0xed   :  { %v431_v22 = vpop.f32.mrf.mxu0 }
  0xfa   :  { %v498_v23 = vpop.eup %497 }
  0xfb   :  { %449 = vmatmul.mubr.bf16.vlgmr.msra.gmra.mxu1 %v498_v23 }
 0x1bb   :  { %v230_v30 = vpop.f32.mrf.mxu1 }
 0x1bc   :  { %v231_v31 = vadd.f32 %v385_v29, %v230_v30 }
 0x1bd   :  { %v450_v32 = vpop.f32.mrf.mxu1 }
 0x1be   :  { %v236_v33 = vpack.c.bf16 %v231_v31, %v231_v31 }
 0x1bf   :  { %v233_v34 = vpop.f32.mrf.mxu1 }
 0x1c0   :  { %499 = vtanh.bf16 %v236_v33 }
 0x1c1   :  { %v451_v35 = vpop.f32.mrf.mxu1 }
 0x1ce   :  { %v500_v36 = vpop.eup %499 }
 0x1cf   :  { %469 = vmatmul.mubr.bf16.vlgmr.msra.gmra.mxu0 %v500_v36 }
 0x28f   :  { %v343_v38 = vpop.f32.mrf.mxu0 }
 0x290   :  { %v344_v39 = vadd.f32 %v394_v37, %v343_v38 }
 0x291   :  { %v470_v40 = vpop.f32.mrf.mxu0 }
 0x292   :  { %v350_v41 = vsel %vm349_vm2, %v344_v39, -inf }
 0x293   :  { %351 = vmax.xlane.f32.xlu0 %v350_v41  ;;  %v346_v42 = vpop.f32.mrf.mxu0 }
 0x295   :  { %v471_v43 = vpop.f32.mrf.mxu0 }
 0x31c   :  { %v352_v44 = vpop.xlane.xlu0 %351 }
 0x31d   :  { %v353_v45 = vsub.f32 %v344_v39, %v352_v44 }
 0x31f   :  { %v354_v46 = vmul.f32 1.442695, %v353_v45 }
 0x321   :  { %501 = vpow2.f32 %v354_v46 }
 0x32e   :  { %v502_v47 = vpop.eup %501 }
 0x32f   :  { %v356_v48 = vsel %vm349_vm2, %v502_v47, 0.0 }
 0x330   :  { %357 = vadd.xlane.f32.xlu0 %v356_v48 }
 0x3b9   :  { %v358_v49 = vpop.xlane.xlu0 %357 }
 0x3ba   :  { %503 = vrcp.f32 %v358_v49 }
 0x3c7   :  { %v504_v50 = vpop.eup %503 }
 0x3c8   :  { %v360_v51 = vmul.f32 %v504_v50, %v358_v49 }
 0x3ca   :  { %v361_v52 = vsub.f32 2.0, %v360_v51 }
 0x3cc   :  { %v362_v53 = vmul.f32 %v504_v50, %v361_v52 }
 0x3ce   :  { %v363_v54 = vmul.f32 %v502_v47, %v362_v53 }
 0x3d0   :  { %364 = vst.msk [vmem:[#allocation7] sm:$0xff] %vm349_vm2, %v363_v54 }
 0x3d1   :  { %556 = shalt.err (!%p553_p0)
}
 0x3d2   :  { %374 = dma.vmem_to_hbm [thread:$0]  %s372_s6, 128, %s718_s7, [#allocation4]  }
 0x3d3   :  { %569 = dma.done.wait [#allocation4], 128  }
 0x3d4   :  { %570 = vsyncadd [#allocation4], 4294967168 }
 0x3d5   :  { %378 = vsyncpa [#allocation3], 1 }
 0x3d6   :  { %379 = vsyncpa [#allocation6], 1 }
 0x3d7   :  { %380 = vsyncpa [#allocation4], 1 }

</bundles_post_ra>
